<compile_context>
chip_gen: v5e
topology: v5e:2x2
jax: 0.10.0
libtpu: 0.0.40
codegen_flags: <defaults>
</compile_context>

<pallas_src>
import jax
import jax.numpy as jnp
import numpy as np
from jax.experimental import pallas as pl
from jax.experimental.pallas import tpu as pltpu


def _round_up(x: int, m: int) -> int:
    return ((x + m - 1) // m) * m


def _sine_embedder_kernel(em_ref, sine_ref, w_ref, b_ref, o_ref):
    # em_ref:   (1, 1)    int32  effective_max, in SMEM
    # sine_ref: (TB, 1)   int32  raw sine values (255 sentinel included)
    # w_ref:    (1, dim)  f32    Linear(1, dim) weight as a row (W.T)
    # b_ref:    (1, dim)  f32    bias as a row
    # o_ref:    (TB, dim) out    embeddings
    em_i = em_ref[0, 0]
    em_f = em_i.astype(jnp.float32)
    s = sine_ref[...]
    s = jnp.where(s == 255, em_i, s)
    val = 1.0 - s.astype(jnp.float32) / em_f          # (TB, 1), matches torch div
    o_ref[...] = (val * w_ref[...] + b_ref[...]).astype(o_ref.dtype)


def init_params(key, dim):
    """Init matching torch.nn.Linear(1, dim): U(-k, k) with k = 1/sqrt(in_features) = 1."""
    kw, kb = jax.random.split(key)
    weight = jax.random.uniform(kw, (dim, 1), jnp.float32, -1.0, 1.0)  # torch layout (out, in)
    bias = jax.random.uniform(kb, (dim,), jnp.float32, -1.0, 1.0)
    return {
        "weight": weight,
        "bias": bias,
        "w_row": weight.T.reshape(1, dim),   # (1, dim) row for the kernel
        "b_row": bias.reshape(1, dim),       # (1, dim) row for the kernel
    }


def _jnp_forward_batched(params, sines, effective_max):
    """Fused jnp path for tiny batches (Pallas dispatch would be pure overhead)."""
    s = jnp.asarray(sines, jnp.int32)
    em = jnp.int32(effective_max)
    s = jnp.where(s == 255, em, s)
    val = 1.0 - s.astype(jnp.float32) / em.astype(jnp.float32)
    return val[:, None] * params["w_row"] + params["b_row"]


def _choose_tile(B: int, dim: int, block_b: int, out_itemsize: int) -> int:
    """Pick a batch tile: multiple of 8 sublanes, <= requested block, capped so the
    double-buffered output tile stays well under every generation's VMEM (incl. v7x)."""
    max_tile_bytes = 8 * 1024 * 1024          # per output buffer; x2 for double buffering
    cap = max(8, (max_tile_bytes // max(1, dim * out_itemsize)) // 8 * 8)
    tb = min(block_b, cap, _round_up(B, 8))
    return max(8, _round_up(tb, 8) if tb % 8 else tb)


def sine_embedder_forward_batched(params, sines, effective_max, *,
                                  block_b=512, out_dtype=jnp.float32,
                                  min_pallas_rows=1024):
    """Embed a batch of integer sine values.  sines: (B,) int -> (B, dim)."""
    if int(effective_max) == 0:
        raise ValueError("effective_max must be nonzero")
    sines = jnp.asarray(sines, jnp.int32)
    B = int(sines.shape[0])
    dim = params["w_row"].shape[1]

    # Tiny batches: XLA fuses the jnp expression and hits roofline for free.
    if B < min_pallas_rows:
        return _jnp_forward_batched(params, sines, effective_max).astype(out_dtype)

    out_itemsize = jnp.dtype(out_dtype).itemsize
    tb = _choose_tile(B, dim, block_b, out_itemsize)
    Bp = _round_up(B, tb)                     # pad instead of the old tb=B fallback
    grid = (Bp // tb,)

    sines_p = jnp.zeros((Bp, 1), jnp.int32).at[:B, 0].set(sines)
    em = jnp.full((1, 1), int(effective_max), jnp.int32)

    out = pl.pallas_call(
        _sine_embedder_kernel,
        out_shape=jax.ShapeDtypeStruct((Bp, dim), out_dtype),
        grid=grid,
        in_specs=[
            pl.BlockSpec(memory_space=pltpu.MemorySpace.SMEM),   # effective_max scalar
            pl.BlockSpec((tb, 1), lambda i: (i, 0)),             # sine tile
            pl.BlockSpec((1, dim), lambda i: (0, 0)),            # weight resident in VMEM
            pl.BlockSpec((1, dim), lambda i: (0, 0)),            # bias resident in VMEM
        ],
        out_specs=pl.BlockSpec((tb, dim), lambda i: (i, 0)),
        compiler_params=pltpu.CompilerParams(
            dimension_semantics=("parallel",)),                   # shards grid on v7x
        cost_estimate=pl.CostEstimate(
            flops=2 * Bp * dim,
            transcendentals=0,
            bytes_accessed=out_itemsize * Bp * dim + 4 * Bp + 8 * dim),
    )(em, sines_p, params["w_row"], params["b_row"])
    return out[:B]


def sine_embedder_forward(params, sine, effective_max):
    """Matches SineEmbedder.forward for a single integer sine -> (dim,) tensor."""
    out = _jnp_forward_batched(params, jnp.asarray([sine], jnp.int32), effective_max)
    return out[0]


def reference_forward_batched(params, sines, effective_max):
    """Pure-JAX reference mirroring the PyTorch code path, vectorized over sines."""
    s = jnp.asarray(sines, jnp.int32)
    s = jnp.where(s == 255, effective_max, s)
    val = 1.0 - s.astype(jnp.float32) / float(effective_max)          # (B,)
    return val[:, None] * params["weight"][:, 0][None, :] + params["bias"][None, :]


if __name__ == "__main__":
    dim = 128            # lane-dense output (any dim supported)
    effective_max = 100
    B = 256              # small demo batch; non-divisible tail handled by padding

    key = jax.random.PRNGKey(0)
    k_params, k_sines = jax.random.split(key)
    params = init_params(k_params, dim)

    sines = jax.random.randint(k_sines, (B,), 0, 256, dtype=jnp.int32)
    sines = sines.at[0].set(255)   # exercise the sentinel path explicitly

    ref = reference_forward_batched(params, sines, effective_max)

    # 1) Pallas path (force it even at this small demo size to exercise the kernel).
    out_pallas = sine_embedder_forward_batched(
        params, sines, effective_max, block_b=512, min_pallas_rows=0)
    out_pallas = jax.block_until_ready(out_pallas)
    np.testing.assert_allclose(np.asarray(out_pallas), np.asarray(ref),
                               rtol=1e-6, atol=1e-6)

    # 2) Default auto-dispatch path (tiny batch -> fused jnp, no Pallas overhead).
    out_auto = jax.block_until_ready(
        sine_embedder_forward_batched(params, sines, effective_max))
    np.testing.assert_allclose(np.asarray(out_auto), np.asarray(ref),
                               rtol=1e-6, atol=1e-6)

    # 3) Single-call path matching the module's forward(sine: int) -> (dim,)
    single = jax.block_until_ready(sine_embedder_forward(params, 255, effective_max))
    np.testing.assert_allclose(np.asarray(single), np.asarray(ref[0]),
                               rtol=1e-6, atol=1e-6)

    print("KERNEL_OK")
</pallas_src>

<mosaic_0001>
module attributes {stable_mosaic.version = 11 : i64} {
  func.func @_sine_embedder_kernel(%arg0: i32, %arg1: memref<1x1xi32, #tpu.memory_space<smem>>, %arg2: memref<256x1xi32, #tpu.memory_space<vmem>>, %arg3: memref<1x128xf32, #tpu.memory_space<vmem>>, %arg4: memref<1x128xf32, #tpu.memory_space<vmem>>, %arg5: memref<256x128xf32, #tpu.memory_space<vmem>>) attributes {dimension_semantics = [#tpu.dimension_semantics<parallel>], iteration_bounds = array<i64: 1>, scalar_prefetch = 0 : i64, scratch_operands = 0 : i64, tpu.core_type = #tpu.core_type<tc>, window_params = [{transform_indices = @transform_0, window_bounds = array<i64: 1, 1>}, {transform_indices = @transform_1, window_bounds = array<i64: 256, 1>}, {pipeline_mode = #tpu.pipeline_mode<synchronous>, transform_indices = @transform_2, window_bounds = array<i64: 1, 128>}, {pipeline_mode = #tpu.pipeline_mode<synchronous>, transform_indices = @transform_3, window_bounds = array<i64: 1, 128>}, {transform_indices = @transform_4, window_bounds = array<i64: 256, 128>}]} {
    %c0 = arith.constant 0 : index
    %c0_0 = arith.constant 0 : index
    %0 = memref.load %arg1[%c0, %c0_0] : memref<1x1xi32, #tpu.memory_space<smem>>
    %1 = arith.sitofp %0 : i32 to f32
    %c0_1 = arith.constant 0 : index
    %c0_2 = arith.constant 0 : index
    %2 = vector.load %arg2[%c0_1, %c0_2] : memref<256x1xi32, #tpu.memory_space<vmem>>, vector<256x1xi32>
    %c255_i32 = arith.constant 255 : i32
    %3 = vector.broadcast %c255_i32 : i32 to vector<256x1xi32>
    %4 = arith.cmpi eq, %2, %3 : vector<256x1xi32>
    %5 = vector.broadcast %0 : i32 to vector<256x1xi32>
    %6 = arith.select %4, %5, %2 : vector<256x1xi1>, vector<256x1xi32>
    %7 = arith.sitofp %6 : vector<256x1xi32> to vector<256x1xf32>
    %8 = vector.broadcast %1 : f32 to vector<256x1xf32>
    %9 = arith.divf %7, %8 : vector<256x1xf32>
    %cst = arith.constant 1.000000e+00 : f32
    %10 = vector.broadcast %cst : f32 to vector<256x1xf32>
    %11 = arith.subf %10, %9 : vector<256x1xf32>
    %c0_3 = arith.constant 0 : index
    %c0_4 = arith.constant 0 : index
    %12 = vector.load %arg3[%c0_3, %c0_4] : memref<1x128xf32, #tpu.memory_space<vmem>>, vector<1x128xf32>
    %13 = vector.broadcast %11 : vector<256x1xf32> to vector<256x128xf32>
    %14 = vector.broadcast %12 : vector<1x128xf32> to vector<256x128xf32>
    %15 = arith.mulf %13, %14 : vector<256x128xf32>
    %c0_5 = arith.constant 0 : index
    %c0_6 = arith.constant 0 : index
    %16 = vector.load %arg4[%c0_5, %c0_6] : memref<1x128xf32, #tpu.memory_space<vmem>>, vector<1x128xf32>
    %17 = vector.broadcast %16 : vector<1x128xf32> to vector<256x128xf32>
    %18 = arith.addf %15, %17 : vector<256x128xf32>
    %c0_7 = arith.constant 0 : index
    %c0_8 = arith.constant 0 : index
    %19 = vector.load %arg5[%c0_7, %c0_8] : memref<256x128xf32, #tpu.memory_space<vmem>>, vector<256x128xf32>
    tpu.vector_store %arg5[%c0_7, %c0_8], %18 {strides = array<i32>} : memref<256x128xf32, #tpu.memory_space<vmem>>, vector<256x128xf32>,
    return
  }
  func.func @transform_0(%arg0: i32) -> (i32, i32) {
    %c0_i32 = arith.constant 0 : i32
    %c0_i32_0 = arith.constant 0 : i32
    %c0_i32_1 = arith.constant 0 : i32
    return %c0_i32, %c0_i32_0 : i32, i32
  }
  func.func @transform_1(%arg0: i32) -> (i32, i32) {
    %c0_i32 = arith.constant 0 : i32
    %c0_i32_0 = arith.constant 0 : i32
    return %arg0, %c0_i32 : i32, i32
  }
  func.func @transform_2(%arg0: i32) -> (i32, i32) {
    %c0_i32 = arith.constant 0 : i32
    %c0_i32_0 = arith.constant 0 : i32
    %c0_i32_1 = arith.constant 0 : i32
    return %c0_i32, %c0_i32_0 : i32, i32
  }
  func.func @transform_3(%arg0: i32) -> (i32, i32) {
    %c0_i32 = arith.constant 0 : i32
    %c0_i32_0 = arith.constant 0 : i32
    %c0_i32_1 = arith.constant 0 : i32
    return %c0_i32, %c0_i32_0 : i32, i32
  }
  func.func @transform_4(%arg0: i32) -> (i32, i32) {
    %c0_i32 = arith.constant 0 : i32
    %c0_i32_0 = arith.constant 0 : i32
    return %arg0, %c0_i32 : i32, i32
  }
}

</mosaic_0001>

<bundles_post_ra>
// kernel: tpu_custom_call.1
= control target key start
LH: loop header
LB: loop body
LE: loop exit
PB: predicated region body
PF: predicated region fallthrough
CT: control target
= control target key end

     0   :  { %v548_v0 = vmov 0   ;;  %s833_s0 = inlined_call_operand.<no memory space> [shape: s32[1,1], index: 0, kind: input, shape index: {}]   ;;  %s834_s1 = inlined_call_operand.vmem [shape: s32[256,1], index: 1, kind: input, shape index: {}]   ;;  %s835_s2 = inlined_call_operand.vmem [shape: f32[1,128], index: 2, kind: input, shape index: {}]   ;;  %s836_s3 = inlined_call_operand.vmem [shape: f32[1,128], index: 3, kind: input, shape index: {}]   ;;  %s837_s4 = inlined_call_operand.hbm [shape: f32[256,128], index: 4, kind: output, shape index: {}]  }
   0x1   :  { %s20_s17 = scvt.s32.f32 %s833_s0  ;;  %517 = vset.pattern.permute.xlu2 %v548_v0  ;;  %516 = vset.pattern.permute.xlu1 %v548_v0 }
   0x2   :  { %515 = vset.pattern.permute.xlu0 %v548_v0 }
   0x3   :  { %v150_v1 = vstv %s20_s17 }
   0x4   :  { %520 = vrcp.f32 %v150_v1 }
   0x5   :  { %10 = vsyncpa [#allocation4], 0  ;;  %v25_v2 = vld [vmem:[%s834_s1 + $0x20] sm:$0xff]  ;;  %v23_v3 = vld [vmem:[%s834_s1 + $0x10] sm:$0xff]  ;;  %v592_v5 = vstv %s833_s0  ;;  %v162_v10 = vand.u32 2147483648, %v150_v1  ;;  %vm156_vm3 = vweird.f32 %v150_v1  ;;  %s499_s8 = sshll.u32 %s837_s4, 4  ;;  %s500_s8 = int_to_ptr.hbm [resolvable:$true] %s499_s8 }
   0x6   :  { %v21_v4 = vld [vmem:[%s834_s1] sm:$0xff]  ;;  %vm57_vm0 = vcmp.eq.s32.totalorder %v25_v2, 255  ;;  %vm55_vm1 = vcmp.eq.s32.totalorder %v23_v3, 255  ;;  %v26_v8 = vld [vmem:[%s834_s1 + $0x28] sm:$0xff]  ;;  %v24_v12 = vld [vmem:[%s834_s1 + $0x18] sm:$0xff]  ;;  %s550_s9 = smov 128  }
   0x7   :  { %vm53_vm2 = vcmp.eq.s32.totalorder %v21_v4, 255  ;;  %v90_v9 = vsel %vm57_vm0, %v592_v5, %v25_v2  ;;  %v88_v11 = vsel %vm55_vm1, %v592_v5, %v23_v3  ;;  %v160_v14 = vand.u32 2147483647, %v150_v1  ;;  %v22_v15 = vld [vmem:[%s834_s1 + $0x8] sm:$0xff]  ;;  %v29_v27 = vld [vmem:[%s834_s1 + $0x40] sm:$0xff]  ;;  %v28_v30 = vld [vmem:[%s834_s1 + $0x38] sm:$0xff] }
   0x8   :  { %v86_v16 = vsel %vm53_vm2, %v592_v5, %v21_v4  ;;  %vm58_vm5 = vcmp.eq.s32.totalorder %v26_v8, 255  ;;  %vm56_vm6 = vcmp.eq.s32.totalorder %v24_v12, 255  ;;  %v122_v18 = vcvt.s32.f32 %v90_v9  ;;  %v27_v35 = vld [vmem:[%s834_s1 + $0x30] sm:$0xff]  ;;  %v32_v46 = vld [vmem:[%s834_s1 + $0x58] sm:$0xff]  ;;  %v30_v52 = vld [vmem:[%s834_s1 + $0x48] sm:$0xff]  ;;  %s551_s10 = smov 8  }
   0x9   :  { %v163_v19 = vor.u32 1.1754944e-38, %v162_v10  ;;  %v120_v20 = vcvt.s32.f32 %v88_v11  ;;  %vm54_vm8 = vcmp.eq.s32.totalorder %v22_v15, 255  ;;  %vm161_vm9 = vcmp.eq.f32.partialorder %v160_v14, 8.507059e+37  ;;  %v31_v47 = vld [vmem:[%s834_s1 + $0x50] sm:$0xff]  ;;  %v34_v61 = vld [vmem:[%s834_s1 + $0x68] sm:$0xff]  ;;  %v33_v63 = vld [vmem:[%s834_s1 + $0x60] sm:$0xff] }
   0xa   :  { %v521_v6 = vpop.eup %520  ;;  %v118_v22 = vcvt.s32.f32 %v86_v16  ;;  %v91_v23 = vsel %vm58_vm5, %v592_v5, %v26_v8  ;;  %v89_v24 = vsel %vm56_vm6, %v592_v5, %v24_v12  ;;  %v87_v26 = vsel %vm54_vm8, %v592_v5, %v22_v15  ;;  %v35_v55 = vld [vmem:[%s834_s1 + $0x70] sm:$0xff]  ;;  %v38_v14 = vld [vmem:[%s834_s1 + $0x88] sm:$0xff]  ;;  %v37_v15 = vld [vmem:[%s834_s1 + $0x80] sm:$0xff] }
   0xb   :  { %v152_v7 = vmul.f32 %v521_v6, %v150_v1  ;;  %vm157_vm4 = vweird.f32 %v521_v6  ;;  %v123_v29 = vcvt.s32.f32 %v91_v23  ;;  %v121_v34 = vcvt.s32.f32 %v89_v24 }
   0xc   :  { %vm158_vm7 = vmor %vm156_vm3, %vm157_vm4  ;;  %v119_v36 = vcvt.s32.f32 %v87_v26  ;;  %vm61_vm10 = vcmp.eq.s32.totalorder %v29_v27, 255  ;;  %vm60_vm11 = vcmp.eq.s32.totalorder %v28_v30, 255  ;;  %vm59_vm12 = vcmp.eq.s32.totalorder %v27_v35, 255 }
   0xd   :  { %v153_v13 = vsub.f32 1.0, %v152_v7  ;;  %v94_v43 = vsel %vm61_vm10, %v592_v5, %v29_v27  ;;  %v93_v44 = vsel %vm60_vm11, %v592_v5, %v28_v30  ;;  %v92_v45 = vsel %vm59_vm12, %v592_v5, %v27_v35  ;;  %v46_v30 = vld [vmem:[%s834_s1 + $0xc8] sm:$0xff]  ;;  %v40_v35 = vld [vmem:[%s834_s1 + $0x98] sm:$0xff] }
   0xe   :  { %v126_v50 = vcvt.s32.f32 %v94_v43  ;;  %v125_v51 = vcvt.s32.f32 %v93_v44  ;;  %v124_v54 = vcvt.s32.f32 %v92_v45  ;;  %vm64_vm13 = vcmp.eq.s32.totalorder %v32_v46, 255 }
   0xf   :  { %v154_v17 = vmul.f32 %v521_v6, %v153_v13  ;;  %vm63_vm14 = vcmp.eq.s32.totalorder %v31_v47, 255  ;;  %vm62_vm15 = vcmp.eq.s32.totalorder %v30_v52, 255  ;;  %v97_v58 = vsel %vm64_vm13, %v592_v5, %v32_v46 }
  0x10   :  { %v96_v60 = vsel %vm63_vm14, %v592_v5, %v31_v47  ;;  %v95_v62 = vsel %vm62_vm15, %v592_v5, %v30_v52  ;;  %vm67_vm0 = vcmp.eq.s32.totalorder %v35_v55, 255  ;;  %v129_v0 = vcvt.s32.f32 %v97_v58 }
  0x11   :  { %v155_v21 = vadd.f32 %v521_v6, %v154_v17  ;;  %v128_v3 = vcvt.s32.f32 %v96_v60  ;;  %vm66_vm1 = vcmp.eq.s32.totalorder %v34_v61, 255  ;;  %v100_v7 = vsel %vm67_vm0, %v592_v5, %v35_v55  ;;  %v50_v55 = vld [vmem:[%s834_s1 + $0xe8] sm:$0xff] }
  0x12   :  { %vm65_vm2 = vcmp.eq.s32.totalorder %v33_v63, 255  ;;  %v99_v8 = vsel %vm66_vm1, %v592_v5, %v34_v61  ;;  %v132_v11 = vcvt.s32.f32 %v100_v7  ;;  %vm70_vm3 = vcmp.eq.s32.totalorder %v38_v14, 255 }
  0x13   :  { %v159_v25 = vsel %vm158_vm7, %v521_v6, %v155_v21  ;;  %v127_v6 = vcvt.s32.f32 %v95_v62  ;;  %v98_v12 = vsel %vm65_vm2, %v592_v5, %v33_v63  ;;  %v131_v16 = vcvt.s32.f32 %v99_v8  ;;  %v44_v63 = vld [vmem:[%s834_s1 + $0xb8] sm:$0xff] }
  0x14   :  { %v612_v28 = vsel %vm161_vm9, %v163_v19, %v159_v25  ;;  %v130_v17 = vcvt.s32.f32 %v98_v12  ;;  %vm69_vm4 = vcmp.eq.s32.totalorder %v37_v15, 255  ;;  %v103_v23 = vsel %vm70_vm3, %v592_v5, %v38_v14 }
  0x15   :  { %v169_v31 = vmul.f32 %v612_v28, %v122_v18  ;;  %v167_v32 = vmul.f32 %v612_v28, %v120_v20  ;;  %v165_v33 = vmul.f32 %v612_v28, %v118_v22  ;;  %v170_v40 = vmul.f32 %v612_v28, %v123_v29  ;;  %v36_v18 = vld [vmem:[%s834_s1 + $0x78] sm:$0xff]  ;;  %v47_v29 = vld [vmem:[%s834_s1 + $0xd0] sm:$0xff] }
  0x16   :  { %v168_v41 = vmul.f32 %v612_v28, %v121_v34  ;;  %v166_v42 = vmul.f32 %v612_v28, %v119_v36  ;;  %v173_v56 = vmul.f32 %v612_v28, %v126_v50  ;;  %v172_v57 = vmul.f32 %v612_v28, %v125_v51 }
  0x17   :  { %v201_v37 = vsub.f32 1.0, %v169_v31  ;;  %v199_v38 = vsub.f32 1.0, %v167_v32  ;;  %v197_v39 = vsub.f32 1.0, %v165_v33  ;;  %v202_v48 = vsub.f32 1.0, %v170_v40  ;;  %v45_v31 = vld [vmem:[%s834_s1 + $0xc0] sm:$0xff]  ;;  %v39_v40 = vld [vmem:[%s834_s1 + $0x90] sm:$0xff] }
  0x18   :  { %v200_v49 = vsub.f32 1.0, %v168_v41  ;;  %v198_v53 = vsub.f32 1.0, %v166_v42  ;;  %v171_v59 = vmul.f32 %v612_v28, %v124_v54  ;;  %v205_v1 = vsub.f32 1.0, %v173_v56  ;;  %v41_v33 = vld [vmem:[%s834_s1 + $0xa0] sm:$0xff] }
  0x19   :  { %252 = vperm.xlu2 %517, %v201_v37   ;;  %242 = vperm.xlu1 %516, %v199_v38   ;;  %v204_v2 = vsub.f32 1.0, %v172_v57  ;;  %v176_v9 = vmul.f32 %v612_v28, %v129_v0  ;;  %v175_v10 = vmul.f32 %v612_v28, %v128_v3  ;;  %v174_v13 = vmul.f32 %v612_v28, %v127_v6  ;;  %v49_v56 = vld [vmem:[%s834_s1 + $0xe0] sm:$0xff]  ;;  %v48_v57 = vld [vmem:[%s834_s1 + $0xd8] sm:$0xff]  ;;  %v43_v0 = vld [vmem:[%s834_s1 + $0xb0] sm:$0xff] }
  0x1a   :  { %232 = vperm.xlu0 %515, %v197_v39   ;;  %v203_v4 = vsub.f32 1.0, %v171_v59  ;;  %v179_v21 = vmul.f32 %v612_v28, %v132_v11  ;;  %vm68_vm5 = vcmp.eq.s32.totalorder %v36_v18, 255  ;;  %v178_v25 = vmul.f32 %v612_v28, %v131_v16 }
  0x1b   :  { %v208_v19 = vsub.f32 1.0, %v176_v9  ;;  %v207_v20 = vsub.f32 1.0, %v175_v10  ;;  %v206_v22 = vsub.f32 1.0, %v174_v13  ;;  %v177_v26 = vmul.f32 %v612_v28, %v130_v17  ;;  %v42_v9 = vld [vmem:[%s834_s1 + $0xa8] sm:$0xff]  ;;  %v52_v17 = vld [vmem:[%s834_s1 + $0xf8] sm:$0xff] }
  0x1c   :  { %v211_v24 = vsub.f32 1.0, %v179_v21  ;;  %v102_v27 = vsel %vm69_vm4, %v592_v5, %v37_v15  ;;  %v101_v32 = vsel %vm68_vm5, %v592_v5, %v36_v18  ;;  %vm79_vm6 = vcmp.eq.s32.totalorder %v47_v29, 255  ;;  %v51_v18 = vld [vmem:[%s834_s1 + $0xf0] sm:$0xff] }
  0x1d   :  { %vm78_vm7 = vcmp.eq.s32.totalorder %v46_v30, 255  ;;  %vm77_vm8 = vcmp.eq.s32.totalorder %v45_v31, 255  ;;  %v135_v34 = vcvt.s32.f32 %v103_v23  ;;  %v112_v36 = vsel %vm79_vm6, %v592_v5, %v47_v29 }
  0x1e   :  { %v111_v37 = vsel %vm78_vm7, %v592_v5, %v46_v30  ;;  %v110_v38 = vsel %vm77_vm8, %v592_v5, %v45_v31  ;;  %v134_v39 = vcvt.s32.f32 %v102_v27  ;;  %v144_v41 = vcvt.s32.f32 %v112_v36 }
  0x1f   :  { %v143_v42 = vcvt.s32.f32 %v111_v37  ;;  %v142_v43 = vcvt.s32.f32 %v110_v38  ;;  %v210_v44 = vsub.f32 1.0, %v178_v25  ;;  %v209_v45 = vsub.f32 1.0, %v177_v26 }
  0x20   :  { %v133_v46 = vcvt.s32.f32 %v101_v32  ;;  %vm73_vm9 = vcmp.eq.s32.totalorder %v41_v33, 255  ;;  %vm72_vm10 = vcmp.eq.s32.totalorder %v40_v35, 255  ;;  %v696_v47 = vmul.f32 %v612_v28, %v144_v41 }
  0x21   :  { %257 = vperm.xlu2 %517, %v202_v48   ;;  %247 = vperm.xlu1 %516, %v200_v49   ;;  %v699_v48 = vmul.f32 %v612_v28, %v143_v42  ;;  %v702_v49 = vmul.f32 %v612_v28, %v142_v43  ;;  %vm71_vm11 = vcmp.eq.s32.totalorder %v39_v40, 255  ;;  %v182_v50 = vmul.f32 %v612_v28, %v135_v34 }
  0x22   :  { %237 = vperm.xlu0 %515, %v198_v53   ;;  %v181_v51 = vmul.f32 %v612_v28, %v134_v39  ;;  %v180_v52 = vmul.f32 %v612_v28, %v133_v46  ;;  %v106_v53 = vsel %vm73_vm9, %v592_v5, %v41_v33  ;;  %v105_v54 = vsel %vm72_vm10, %v592_v5, %v40_v35 }
  0x23   :  { %v104_v58 = vsel %vm71_vm11, %v592_v5, %v39_v40  ;;  %vm82_vm12 = vcmp.eq.s32.totalorder %v50_v55, 255  ;;  %vm81_vm13 = vcmp.eq.s32.totalorder %v49_v56, 255  ;;  %vm80_vm14 = vcmp.eq.s32.totalorder %v48_v57, 255 }
  0x24   :  { %v115_v59 = vsel %vm82_vm12, %v592_v5, %v50_v55  ;;  %v114_v60 = vsel %vm81_vm13, %v592_v5, %v49_v56  ;;  %v113_v61 = vsel %vm80_vm14, %v592_v5, %v48_v57  ;;  %v214_v62 = vsub.f32 1.0, %v182_v50 }
  0x25   :  { %v145_v3 = vcvt.s32.f32 %v113_v61  ;;  %v138_v6 = vcvt.s32.f32 %v106_v53  ;;  %v137_v7 = vcvt.s32.f32 %v105_v54  ;;  %v136_v8 = vcvt.s32.f32 %v104_v58 }
  0x26   :  { %v212_v10 = vsub.f32 1.0, %v180_v52  ;;  %vm76_vm15 = vcmp.eq.s32.totalorder %v44_v63, 255  ;;  %vm75_vm0 = vcmp.eq.s32.totalorder %v43_v0, 255  ;;  %vm74_vm1 = vcmp.eq.s32.totalorder %v42_v9, 255 }
  0x27   :  { %v192_v13 = vmul.f32 %v612_v28, %v145_v3  ;;  %v185_v14 = vmul.f32 %v612_v28, %v138_v6  ;;  %v184_v15 = vmul.f32 %v612_v28, %v137_v7  ;;  %v183_v16 = vmul.f32 %v612_v28, %v136_v8 }
  0x28   :  { %vm84_vm2 = vcmp.eq.s32.totalorder %v52_v17, 255  ;;  %vm83_vm3 = vcmp.eq.s32.totalorder %v51_v18, 255  ;;  %v107_v21 = vsel %vm74_vm1, %v592_v5, %v42_v9  ;;  %v223_v40 = vsub.f32 1.0, %v696_v47  ;;  %v759_v47 = vld [vmem:[%s835_s2] ss:$0 sm:$0xff]  ;;  %s549_s2 = smov [#allocation3]  }
  0x29   :  { %272 = vperm.xlu2 %517, %v205_v1   ;;  %267 = vperm.xlu1 %516, %v204_v2   ;;  %v147_v1 = vcvt.s32.f32 %v115_v59  ;;  %v146_v2 = vcvt.s32.f32 %v114_v60  ;;  %v116_v23 = vsel %vm83_vm3, %v592_v5, %v51_v18  ;;  %v217_v26 = vsub.f32 1.0, %v185_v14 }
  0x2a   :  { %262 = vperm.xlu0 %515, %v203_v4   ;;  %v213_v4 = vsub.f32 1.0, %v181_v51  ;;  %v148_v25 = vcvt.s32.f32 %v116_v23  ;;  %v216_v27 = vsub.f32 1.0, %v184_v15  ;;  %v215_v31 = vsub.f32 1.0, %v183_v16 }
  0x2b   :  { %v194_v11 = vmul.f32 %v612_v28, %v147_v1  ;;  %v193_v12 = vmul.f32 %v612_v28, %v146_v2  ;;  %v139_v32 = vcvt.s32.f32 %v107_v21  ;;  %v222_v41 = vsub.f32 1.0, %v699_v48 }
  0x2c   :  { %v195_v34 = vmul.f32 %v612_v28, %v148_v25  ;;  %v221_v42 = vsub.f32 1.0, %v702_v49  ;;  %v764_v49 = vld [vmem:[%s836_s3] ss:$0 sm:$0xff]  ;;  %s497_s3 = sshll.u32 %s549_s2, 4  ;;  %s498_s3 = int_to_ptr.vmem [resolvable:$true] %s497_s3 }
  0x2d   :  { %v226_v43 = vsub.f32 1.0, %v194_v11 }
  0x2e   :  { %v227_v46 = vsub.f32 1.0, %v195_v34 }
  0x31   :  { %287 = vperm.xlu2 %517, %v208_v19   ;;  %282 = vperm.xlu1 %516, %v207_v20   ;;  %v109_v19 = vsel %vm76_vm15, %v592_v5, %v44_v63  ;;  %v108_v20 = vsel %vm75_vm0, %v592_v5, %v43_v0 }
  0x32   :  { %277 = vperm.xlu0 %515, %v206_v22   ;;  %v117_v22 = vsel %vm84_vm2, %v592_v5, %v52_v17  ;;  %v141_v29 = vcvt.s32.f32 %v109_v19  ;;  %v140_v30 = vcvt.s32.f32 %v108_v20  ;;  %v186_v5 = vmul.f32 %v612_v28, %v139_v32 }
  0x34   :  { %v188_v35 = vmul.f32 %v612_v28, %v141_v29  ;;  %v187_v36 = vmul.f32 %v612_v28, %v140_v30  ;;  %v218_v39 = vsub.f32 1.0, %v186_v5 }
  0x36   :  { %v220_v37 = vsub.f32 1.0, %v188_v35  ;;  %v219_v38 = vsub.f32 1.0, %v187_v36 }
  0x39   :  { %302 = vperm.xlu2 %517, %v211_v24   ;;  %297 = vperm.xlu1 %516, %v210_v44   ;;  %v149_v24 = vcvt.s32.f32 %v117_v22  ;;  %v225_v44 = vsub.f32 1.0, %v193_v12 }
  0x3a   :  { %292 = vperm.xlu0 %515, %v209_v45   ;;  %v224_v45 = vsub.f32 1.0, %v192_v13 }
  0x3b   :  { %v196_v33 = vmul.f32 %v612_v28, %v149_v24 }
  0x3d   :  { %v228_v28 = vsub.f32 1.0, %v196_v33 }
  0x41   :  { %317 = vperm.xlu2 %517, %v214_v62   ;;  %312 = vperm.xlu1 %516, %v213_v4  }
  0x42   :  { %307 = vperm.xlu0 %515, %v212_v10  }
  0x49   :  { %332 = vperm.xlu2 %517, %v217_v26   ;;  %327 = vperm.xlu1 %516, %v216_v27  }
  0x4a   :  { %322 = vperm.xlu0 %515, %v215_v31  }
  0x51   :  { %347 = vperm.xlu2 %517, %v220_v37   ;;  %342 = vperm.xlu1 %516, %v219_v38  }
  0x52   :  { %337 = vperm.xlu0 %515, %v218_v39  }
  0x59   :  { %362 = vperm.xlu2 %517, %v223_v40   ;;  %357 = vperm.xlu1 %516, %v222_v41  }
  0x5a   :  { %352 = vperm.xlu0 %515, %v221_v42  }
  0x61   :  { %377 = vperm.xlu2 %517, %v226_v43   ;;  %372 = vperm.xlu1 %516, %v225_v44  }
  0x62   :  { %367 = vperm.xlu0 %515, %v224_v45  }
  0x69   :  { %387 = vperm.xlu1 %516, %v228_v28  }
  0x6a   :  { %382 = vperm.xlu0 %515, %v227_v46  }
  0x73   :  { %v253_v48 = vpop.permute.xlu2 %252 }
  0x74   :  { %v397_v50 = vmul.f32 %v759_v47, %v253_v48 }
  0x76   :  { %v433_v51 = vadd.f32 %v764_v49, %v397_v50 }
  0x78   :  { %465 = vst [vmem:[#allocation3 + $0x20] sm:$0xff] %v433_v51 }
  0x7b   :  { %v258_v52 = vpop.permute.xlu2 %257 }
  0x7c   :  { %v398_v53 = vmul.f32 %v759_v47, %v258_v52 }
  0x7e   :  { %v434_v54 = vadd.f32 %v764_v49, %v398_v53 }
  0x80   :  { %466 = vst [vmem:[#allocation3 + $0x28] sm:$0xff] %v434_v54 }
  0x83   :  { %v273_v55 = vpop.permute.xlu2 %272 }
  0x84   :  { %v401_v56 = vmul.f32 %v759_v47, %v273_v55 }
  0x86   :  { %v437_v57 = vadd.f32 %v764_v49, %v401_v56 }
  0x88   :  { %469 = vst [vmem:[#allocation3 + $0x40] sm:$0xff] %v437_v57 }
  0x8b   :  { %v288_v58 = vpop.permute.xlu2 %287  ;;  %v243_v59 = vpop.permute.xlu1 %242 }
  0x8c   :  { %v404_v60 = vmul.f32 %v759_v47, %v288_v58  ;;  %v395_v61 = vmul.f32 %v759_v47, %v243_v59  ;;  %v233_v62 = vpop.permute.xlu0 %232 }
  0x8d   :  { %v393_v63 = vmul.f32 %v759_v47, %v233_v62 }
  0x8e   :  { %v440_v0 = vadd.f32 %v764_v49, %v404_v60  ;;  %v431_v1 = vadd.f32 %v764_v49, %v395_v61 }
  0x8f   :  { %v429_v2 = vadd.f32 %v764_v49, %v393_v63 }
  0x90   :  { %472 = vst [vmem:[#allocation3 + $0x58] sm:$0xff] %v440_v0 }
  0x91   :  { %463 = vst [vmem:[#allocation3 + $0x10] sm:$0xff] %v431_v1 }
  0x92   :  { %461 = vst [vmem:[#allocation3] sm:$0xff] %v429_v2 }
  0x93   :  { %v303_v3 = vpop.permute.xlu2 %302  ;;  %v248_v4 = vpop.permute.xlu1 %247 }
  0x94   :  { %v407_v6 = vmul.f32 %v759_v47, %v303_v3  ;;  %v396_v7 = vmul.f32 %v759_v47, %v248_v4  ;;  %v238_v8 = vpop.permute.xlu0 %237 }
  0x95   :  { %v394_v9 = vmul.f32 %v759_v47, %v238_v8 }
  0x96   :  { %v443_v10 = vadd.f32 %v764_v49, %v407_v6  ;;  %v432_v11 = vadd.f32 %v764_v49, %v396_v7 }
  0x97   :  { %v430_v12 = vadd.f32 %v764_v49, %v394_v9 }
  0x98   :  { %475 = vst [vmem:[#allocation3 + $0x70] sm:$0xff] %v443_v10 }
  0x99   :  { %464 = vst [vmem:[#allocation3 + $0x18] sm:$0xff] %v432_v11 }
  0x9a   :  { %462 = vst [vmem:[#allocation3 + $0x8] sm:$0xff] %v430_v12 }
  0x9b   :  { %v318_v13 = vpop.permute.xlu2 %317  ;;  %v268_v14 = vpop.permute.xlu1 %267 }
  0x9c   :  { %v410_v15 = vmul.f32 %v759_v47, %v318_v13  ;;  %v400_v16 = vmul.f32 %v759_v47, %v268_v14  ;;  %v263_v17 = vpop.permute.xlu0 %262 }
  0x9d   :  { %v399_v18 = vmul.f32 %v759_v47, %v263_v17 }
  0x9e   :  { %v446_v19 = vadd.f32 %v764_v49, %v410_v15  ;;  %v436_v20 = vadd.f32 %v764_v49, %v400_v16 }
  0x9f   :  { %v435_v21 = vadd.f32 %v764_v49, %v399_v18 }
  0xa0   :  { %478 = vst [vmem:[#allocation3 + $0x88] sm:$0xff] %v446_v19 }
  0xa1   :  { %468 = vst [vmem:[#allocation3 + $0x38] sm:$0xff] %v436_v20 }
  0xa2   :  { %467 = vst [vmem:[#allocation3 + $0x30] sm:$0xff] %v435_v21 }
  0xa3   :  { %v333_v22 = vpop.permute.xlu2 %332  ;;  %v283_v23 = vpop.permute.xlu1 %282 }
  0xa4   :  { %v413_v24 = vmul.f32 %v759_v47, %v333_v22  ;;  %v403_v25 = vmul.f32 %v759_v47, %v283_v23  ;;  %v278_v26 = vpop.permute.xlu0 %277 }
  0xa5   :  { %v402_v27 = vmul.f32 %v759_v47, %v278_v26 }
  0xa6   :  { %v449_v29 = vadd.f32 %v764_v49, %v413_v24  ;;  %v439_v30 = vadd.f32 %v764_v49, %v403_v25 }
  0xa7   :  { %v438_v31 = vadd.f32 %v764_v49, %v402_v27 }
  0xa8   :  { %481 = vst [vmem:[#allocation3 + $0xa0] sm:$0xff] %v449_v29 }
  0xa9   :  { %471 = vst [vmem:[#allocation3 + $0x50] sm:$0xff] %v439_v30 }
  0xaa   :  { %470 = vst [vmem:[#allocation3 + $0x48] sm:$0xff] %v438_v31 }
  0xab   :  { %v348_v32 = vpop.permute.xlu2 %347  ;;  %v298_v33 = vpop.permute.xlu1 %297 }
  0xac   :  { %v416_v34 = vmul.f32 %v759_v47, %v348_v32  ;;  %v406_v35 = vmul.f32 %v759_v47, %v298_v33  ;;  %v293_v36 = vpop.permute.xlu0 %292 }
  0xad   :  { %v405_v5 = vmul.f32 %v759_v47, %v293_v36 }
  0xae   :  { %v452_v37 = vadd.f32 %v764_v49, %v416_v34  ;;  %v442_v38 = vadd.f32 %v764_v49, %v406_v35 }
  0xaf   :  { %v441_v39 = vadd.f32 %v764_v49, %v405_v5 }
  0xb0   :  { %484 = vst [vmem:[#allocation3 + $0xb8] sm:$0xff] %v452_v37 }
  0xb1   :  { %474 = vst [vmem:[#allocation3 + $0x68] sm:$0xff] %v442_v38 }
  0xb2   :  { %473 = vst [vmem:[#allocation3 + $0x60] sm:$0xff] %v441_v39 }
  0xb3   :  { %v363_v40 = vpop.permute.xlu2 %362  ;;  %v313_v41 = vpop.permute.xlu1 %312 }
  0xb4   :  { %v419_v42 = vmul.f32 %v759_v47, %v363_v40  ;;  %v409_v43 = vmul.f32 %v759_v47, %v313_v41  ;;  %v308_v44 = vpop.permute.xlu0 %307 }
  0xb5   :  { %v408_v45 = vmul.f32 %v759_v47, %v308_v44 }
  0xb6   :  { %v455_v28 = vadd.f32 %v764_v49, %v419_v42  ;;  %v445_v46 = vadd.f32 %v764_v49, %v409_v43 }
  0xb7   :  { %v444_v48 = vadd.f32 %v764_v49, %v408_v45 }
  0xb8   :  { %487 = vst [vmem:[#allocation3 + $0xd0] sm:$0xff] %v455_v28 }
  0xb9   :  { %477 = vst [vmem:[#allocation3 + $0x80] sm:$0xff] %v445_v46 }
  0xba   :  { %476 = vst [vmem:[#allocation3 + $0x78] sm:$0xff] %v444_v48 }
  0xbb   :  { %v378_v50 = vpop.permute.xlu2 %377  ;;  %v328_v51 = vpop.permute.xlu1 %327 }
  0xbc   :  { %v422_v52 = vmul.f32 %v759_v47, %v378_v50  ;;  %v412_v53 = vmul.f32 %v759_v47, %v328_v51  ;;  %v323_v54 = vpop.permute.xlu0 %322 }
  0xbd   :  { %v411_v55 = vmul.f32 %v759_v47, %v323_v54 }
  0xbe   :  { %v458_v56 = vadd.f32 %v764_v49, %v422_v52  ;;  %v448_v57 = vadd.f32 %v764_v49, %v412_v53 }
  0xbf   :  { %v447_v58 = vadd.f32 %v764_v49, %v411_v55 }
  0xc0   :  { %490 = vst [vmem:[#allocation3 + $0xe8] sm:$0xff] %v458_v56 }
  0xc1   :  { %480 = vst [vmem:[#allocation3 + $0x98] sm:$0xff] %v448_v57 }
  0xc2   :  { %479 = vst [vmem:[#allocation3 + $0x90] sm:$0xff] %v447_v58 }
  0xc3   :  { %v343_v59 = vpop.permute.xlu1 %342 }
  0xc4   :  { %v415_v60 = vmul.f32 %v759_v47, %v343_v59  ;;  %v338_v61 = vpop.permute.xlu0 %337 }
  0xc5   :  { %v414_v62 = vmul.f32 %v759_v47, %v338_v61 }
  0xc6   :  { %v451_v63 = vadd.f32 %v764_v49, %v415_v60 }
  0xc7   :  { %v450_v0 = vadd.f32 %v764_v49, %v414_v62 }
  0xc8   :  { %483 = vst [vmem:[#allocation3 + $0xb0] sm:$0xff] %v451_v63 }
  0xc9   :  { %482 = vst [vmem:[#allocation3 + $0xa8] sm:$0xff] %v450_v0 }
  0xcb   :  { %v358_v1 = vpop.permute.xlu1 %357 }
  0xcc   :  { %v418_v2 = vmul.f32 %v759_v47, %v358_v1  ;;  %v353_v3 = vpop.permute.xlu0 %352 }
  0xcd   :  { %v417_v4 = vmul.f32 %v759_v47, %v353_v3 }
  0xce   :  { %v454_v6 = vadd.f32 %v764_v49, %v418_v2 }
  0xcf   :  { %v453_v7 = vadd.f32 %v764_v49, %v417_v4 }
  0xd0   :  { %486 = vst [vmem:[#allocation3 + $0xc8] sm:$0xff] %v454_v6 }
  0xd1   :  { %485 = vst [vmem:[#allocation3 + $0xc0] sm:$0xff] %v453_v7 }
  0xd3   :  { %v373_v8 = vpop.permute.xlu1 %372 }
  0xd4   :  { %v421_v9 = vmul.f32 %v759_v47, %v373_v8  ;;  %v368_v10 = vpop.permute.xlu0 %367 }
  0xd5   :  { %v420_v11 = vmul.f32 %v759_v47, %v368_v10 }
  0xd6   :  { %v457_v12 = vadd.f32 %v764_v49, %v421_v9 }
  0xd7   :  { %v456_v13 = vadd.f32 %v764_v49, %v420_v11 }
  0xd8   :  { %489 = vst [vmem:[#allocation3 + $0xe0] sm:$0xff] %v457_v12 }
  0xd9   :  { %488 = vst [vmem:[#allocation3 + $0xd8] sm:$0xff] %v456_v13 }
  0xdb   :  { %v388_v14 = vpop.permute.xlu1 %387 }
  0xdc   :  { %v424_v15 = vmul.f32 %v759_v47, %v388_v14  ;;  %v383_v16 = vpop.permute.xlu0 %382 }
  0xdd   :  { %v423_v17 = vmul.f32 %v759_v47, %v383_v16 }
  0xde   :  { %v460_v18 = vadd.f32 %v764_v49, %v424_v15 }
  0xdf   :  { %v459_v19 = vadd.f32 %v764_v49, %v423_v17 }
  0xe0   :  { %492 = vst [vmem:[#allocation3 + $0xf8] sm:$0xff] %v460_v18 }
  0xe1   :  { %491 = vst [vmem:[#allocation3 + $0xf0] sm:$0xff] %v459_v19 }
  0xe2   :  { %505 = dma.vmem_to_hbm [thread:$0]  %s498_s3, 4096, %s500_s8, [#allocation4], %s550_s9, %s550_s9, %s551_s10  }
  0xe3   :  { %546 = dma.done.wait [#allocation4], 4096  }
  0xe4   :  { %547 = vsyncadd [#allocation4], 4294963200 }
  0xe5   :  { %510 = vsyncpa [#allocation4], 1 }

</bundles_post_ra>
